<compile_context>
chip_gen: v7x
topology: tpu7x:2x2x1
jax: 0.10.0
libtpu: 0.0.40
codegen_flags: <defaults>
</compile_context>

<pallas_src>
import jax
import jax.numpy as jnp
from jax.experimental import pallas as pl
from jax.experimental.pallas import tpu as pltpu

LANES = 128


def _cdiv(a, b):
    return -(-a // b)


def _round_up(a, b):
    return _cdiv(a, b) * b


def _fold_params(params, eps=1e-5):
    """Fold eval-mode BatchNorm into conv weights/bias.

    Returns a list of (w_folded (k, C_in, C_out) f32, b_folded (C_out,) f32).
    """
    folded = []
    for p in params:
        inv_std = 1.0 / jnp.sqrt(p["var"].astype(jnp.float32) + eps)
        scale = p["gamma"].astype(jnp.float32) * inv_std                # (C_out,)
        shift = p["beta"].astype(jnp.float32) - p["mean"].astype(jnp.float32) * scale
        w_f = p["w"].astype(jnp.float32) * scale[None, None, :]
        b_f = p["b"].astype(jnp.float32) * scale + shift
        folded.append((w_f, b_f))
    return folded


def _pack_banded_mats(w_f, P, h):
    """Block-banded matrices C_m (128,128) for the time-packed layout.

    Layout: packed row r, lane p*h + c  <->  time r*P + p, channel c.
    The valid conv  y[t] = sum_j x[t+j] @ W[j]  becomes
        Y[r] = sum_m X[r+m] @ C_m,
    with C_m[q*h+ci, p*h+co] = W[q + m*P - p][ci, co] (zero where out of range).
    """
    ksz = w_f.shape[0]
    m_span = 1 + (ksz - 2) // P                     # max row offset read
    mats = []
    for m in range(m_span + 1):
        c = jnp.zeros((LANES, LANES), jnp.float32)
        for q in range(P):
            for p in range(P):
                j = q + m * P - p
                if 0 <= j < ksz:
                    c = c.at[q * h:(q + 1) * h, p * h:(p + 1) * h].set(w_f[j])
        mats.append(c)
    return mats


def _make_bank_kernel(layer_plan, compute_dtype):
    """layer_plan: tuple of (mat_offset, n_span, out_rows) for layers 2..K."""
    n_layers = len(layer_plan)

    def kernel(x_ref, w1_ref, wt_ref, b_ref, o_ref, buf_a, buf_b):
        b_all = b_ref[...]                                  # (K, 128) f32

        # Layer 1: Conv1d(1, H, 1) + BN.  The tiny matmul also performs the
        # scalar -> (P blocks of H lanes) expansion; contraction dim = 8.
        y = jnp.dot(x_ref[...], w1_ref[...],
                    preferred_element_type=jnp.float32) + b_all[0:1, :]
        buf_a[...] = y                                      # f32 activations

        # Layers 2..K: block-banded matmuls, ping-pong f32 VMEM buffers.
        bufs = (buf_a, buf_b)
        for li, (mat_off, n_span, r_out) in enumerate(layer_plan):
            src = bufs[li % 2]
            dst = bufs[(li + 1) % 2]
            # acc initialized from the first tap's dot (no zeros+add chain).
            acc = jnp.dot(src[pl.ds(0, r_out), :].astype(compute_dtype),
                          wt_ref[mat_off],
                          preferred_element_type=jnp.float32)
            for m in range(1, n_span):                      # static unroll
                acc = acc + jnp.dot(
                    src[pl.ds(m, r_out), :].astype(compute_dtype),
                    wt_ref[mat_off + m],
                    preferred_element_type=jnp.float32)
            y = acc + b_all[li + 1:li + 2, :]               # folded bias + BN
            if li == n_layers - 1:
                o_ref[...] = y.astype(o_ref.dtype)          # last layer -> HBM
            else:
                dst[pl.ds(0, r_out), :] = y
    return kernel


def cbhg_conv_bank_forward(x_ncl, params, *, eps=1e-5,
                           compute_dtype=jnp.bfloat16):
    """x_ncl: (N, 1, T) in PyTorch NCL layout.  Returns (N, H, T_final) NCL."""
    n, c_in0, t0 = x_ncl.shape
    assert c_in0 == 1, "first conv of the bank is Conv1d(1, H, 1)"
    K = len(params)
    assert K >= 2, "conv bank needs at least the k=1 and k=2 convs"
    h = params[0]["w"].shape[2]
    assert h <= LANES
    t_final = t0 - (K * (K - 1)) // 2
    assert t_final > 0, "sequence too short for this K with valid convs"

    folded = _fold_params(params, eps)

    # Time-packed layout parameters.
    P = LANES // h if LANES % h == 0 else 1      # time steps packed per row
    p_lanes = max(P, 8)                          # layer-1 contraction width
    rows_final = _cdiv(t_final, P)
    rows_out = _round_up(rows_final, 8)          # output rows per batch elem
    m_spans = [1 + (k - 2) // P for k in range(2, K + 1)]
    x_rows = _round_up(rows_out + sum(m_spans), 8)   # layer-1 rows per batch

    # ---- pack folded parameters --------------------------------------------
    w1_vec, b1_vec = folded[0][0][0, 0, :], folded[0][1]
    w1e = jnp.zeros((p_lanes, LANES), jnp.float32)       # layer-1 expansion
    for p in range(P):
        w1e = w1e.at[p, p * h:(p + 1) * h].set(w1_vec)
    b_all = jnp.zeros((K, LANES), jnp.float32)
    b_all = b_all.at[0, :P * h].set(jnp.tile(b1_vec, P))

    mats, layer_plan, mat_off, suffix = [], [], 0, sum(m_spans)
    for idx, ksz in enumerate(range(2, K + 1)):
        w_f, b_f = folded[idx + 1]
        layer_mats = _pack_banded_mats(w_f, P, h)
        suffix -= m_spans[idx]
        layer_plan.append((mat_off, len(layer_mats), rows_out + suffix))
        mats.extend(layer_mats)
        mat_off += len(layer_mats)
        b_all = b_all.at[idx + 1, :P * h].set(jnp.tile(b_f, P))
    w_taps = jnp.stack(mats, axis=0).astype(compute_dtype)  # (n_mats,128,128)

    # ---- pack the 1-channel input: (N, 1, T) -> (N*x_rows, 8) f32 ----------
    x_sq = x_ncl[:, 0, :].astype(jnp.float32)
    x_sq = jnp.pad(x_sq, ((0, 0), (0, x_rows * P - t0)))
    x_pk = x_sq.reshape(n, x_rows, P)
    if p_lanes > P:
        x_pk = jnp.pad(x_pk, ((0, 0), (0, 0), (0, p_lanes - P)))
    x_pk = x_pk.reshape(n * x_rows, p_lanes)

    kernel = _make_bank_kernel(tuple(layer_plan), compute_dtype)
    out = pl.pallas_call(
        kernel,
        out_shape=jax.ShapeDtypeStruct((n * rows_out, LANES), jnp.float32),
        grid=(n,),
        in_specs=[
            pl.BlockSpec((x_rows, p_lanes), lambda i: (i, 0)),   # packed input
            pl.BlockSpec((p_lanes, LANES), lambda i: (0, 0)),    # layer-1 W
            pl.BlockSpec(w_taps.shape, lambda i: (0, 0, 0)),     # banded taps
            pl.BlockSpec((K, LANES), lambda i: (0, 0)),          # folded biases
        ],
        out_specs=pl.BlockSpec((rows_out, LANES), lambda i: (i, 0)),
        scratch_shapes=[pltpu.VMEM((x_rows, LANES), jnp.float32),
                        pltpu.VMEM((x_rows, LANES), jnp.float32)],
        compiler_params=pltpu.CompilerParams(
            dimension_semantics=("parallel",)),
    )(x_pk, w1e, w_taps, b_all)

    # ---- unpack: rows of (P time steps x h channels) -> (N, H, T_final) ----
    out = out.reshape(n, rows_out, LANES)[:, :, :P * h]
    out = out.reshape(n, rows_out * P, h)[:, :t_final, :]
    return jnp.transpose(out, (0, 2, 1))


def init_cbhg_params(key, K, hidden_size):
    """Deterministic parameters matching the shapes from CBHG.build().
    BN running stats are randomized (as after training) so the BN-folding
    path is actually exercised; eval-mode BN is assumed."""
    params = []
    in_ch = 1
    for k_size in range(1, K + 1):
        key, wk, bk, gk, bek, mk, vk = jax.random.split(key, 7)
        fan_in = in_ch * k_size
        w_torch = jax.random.normal(
            wk, (hidden_size, in_ch, k_size), jnp.float32) / jnp.sqrt(fan_in)
        b = jax.random.normal(bk, (hidden_size,), jnp.float32) * 0.01
        w = jnp.transpose(w_torch, (2, 1, 0))    # (k, C_in, C_out)
        params.append(dict(
            w=w, b=b,
            gamma=1.0 + 0.2 * jax.random.normal(gk, (hidden_size,), jnp.float32),
            beta=0.1 * jax.random.normal(bek, (hidden_size,), jnp.float32),
            mean=0.1 * jax.random.normal(mk, (hidden_size,), jnp.float32),
            var=0.5 + jax.random.uniform(vk, (hidden_size,), jnp.float32),
        ))
        in_ch = hidden_size
    return params


def _reference_f32(x_ncl, params, eps=1e-5):
    """Plain-JAX unfused f32 reference: valid Conv1d + bias, then eval BN."""
    x = jnp.transpose(x_ncl, (0, 2, 1)).astype(jnp.float32)   # (N, T, C)
    for p in params:
        w = p["w"].astype(jnp.float32)                        # (k, C_in, C_out)
        k = w.shape[0]
        t_out = x.shape[1] - k + 1
        acc = jnp.zeros((x.shape[0], t_out, w.shape[2]), jnp.float32)
        for j in range(k):
            acc = acc + jnp.einsum("ntc,cd->ntd", x[:, j:j + t_out, :], w[j])
        y = acc + p["b"][None, None, :]
        inv_std = 1.0 / jnp.sqrt(p["var"] + eps)
        x = (y - p["mean"]) * inv_std * p["gamma"] + p["beta"]
    return jnp.transpose(x, (0, 2, 1))


if __name__ == "__main__":
    key = jax.random.PRNGKey(0)

    # Config 1: K=4, hidden=32 (P=4 time-packing), N=2, T=16.
    K, hidden_size, N, T = 4, 32, 2, 16
    key, xk, pk = jax.random.split(key, 3)
    x = jax.random.normal(xk, (N, 1, T), jnp.float32)
    params = init_cbhg_params(pk, K, hidden_size)
    ref = _reference_f32(x, params)

    # f32 compute path: tight check of packing / windowing / BN-folding.
    out_f32 = jax.block_until_ready(
        cbhg_conv_bank_forward(x, params, compute_dtype=jnp.float32))
    assert out_f32.shape == ref.shape, (out_f32.shape, ref.shape)
    assert jnp.allclose(out_f32, ref, atol=1e-3, rtol=1e-3), (
        "f32 path mismatch, max abs diff = %e"
        % float(jnp.max(jnp.abs(out_f32 - ref))))

    # bf16 MXU path (perf default): f32 activations/accumulation, bf16 dots.
    out_bf16 = jax.block_until_ready(
        cbhg_conv_bank_forward(x, params, compute_dtype=jnp.bfloat16))
    assert out_bf16.shape == ref.shape, (out_bf16.shape, ref.shape)
    assert jnp.allclose(out_bf16, ref, atol=1e-1, rtol=5e-2), (
        "bf16 path mismatch, max abs diff = %e"
        % float(jnp.max(jnp.abs(out_bf16 - ref))))

    # Config 2: K=3, hidden=64 (P=2 packing), N=1, T=12 — different geometry.
    K2, h2, N2, T2 = 3, 64, 1, 12
    key, xk2, pk2 = jax.random.split(key, 3)
    x2 = jax.random.normal(xk2, (N2, 1, T2), jnp.float32)
    params2 = init_cbhg_params(pk2, K2, h2)
    ref2 = _reference_f32(x2, params2)
    out2 = jax.block_until_ready(
        cbhg_conv_bank_forward(x2, params2, compute_dtype=jnp.float32))
    assert out2.shape == ref2.shape, (out2.shape, ref2.shape)
    assert jnp.allclose(out2, ref2, atol=1e-3, rtol=1e-3), (
        "config-2 mismatch, max abs diff = %e"
        % float(jnp.max(jnp.abs(out2 - ref2))))

    print("KERNEL_OK")
</pallas_src>

<mosaic_0001>
module attributes {stable_mosaic.version = 11 : i64} {
  func.func @kernel(%arg0: i32, %arg1: memref<16x8xf32, #tpu.memory_space<vmem>>, %arg2: memref<8x128xf32, #tpu.memory_space<vmem>>, %arg3: memref<6x128x128xf32, #tpu.memory_space<vmem>>, %arg4: memref<4x128xf32, #tpu.memory_space<vmem>>, %arg5: memref<8x128xf32, #tpu.memory_space<vmem>>, %arg6: memref<16x128xf32, #tpu.memory_space<vmem>>, %arg7: memref<16x128xf32, #tpu.memory_space<vmem>>) attributes {dimension_semantics = [#tpu.dimension_semantics<parallel>], iteration_bounds = array<i64: 2>, scalar_prefetch = 0 : i64, scratch_operands = 2 : i64, tpu.core_type = #tpu.core_type<tc>, window_params = [{transform_indices = @transform_0, window_bounds = array<i64: 16, 8>}, {pipeline_mode = #tpu.pipeline_mode<synchronous>, transform_indices = @transform_1, window_bounds = array<i64: 8, 128>}, {pipeline_mode = #tpu.pipeline_mode<synchronous>, transform_indices = @transform_2, window_bounds = array<i64: 6, 128, 128>}, {pipeline_mode = #tpu.pipeline_mode<synchronous>, transform_indices = @transform_3, window_bounds = array<i64: 4, 128>}, {transform_indices = @transform_4, window_bounds = array<i64: 8, 128>}]} {
    %c0 = arith.constant 0 : index
    %c0_0 = arith.constant 0 : index
    %0 = vector.load %arg4[%c0, %c0_0] : memref<4x128xf32, #tpu.memory_space<vmem>>, vector<4x128xf32>
    %c0_1 = arith.constant 0 : index
    %c0_2 = arith.constant 0 : index
    %1 = vector.load %arg1[%c0_1, %c0_2] : memref<16x8xf32, #tpu.memory_space<vmem>>, vector<16x8xf32>
    %c0_3 = arith.constant 0 : index
    %c0_4 = arith.constant 0 : index
    %2 = vector.load %arg2[%c0_3, %c0_4] : memref<8x128xf32, #tpu.memory_space<vmem>>, vector<8x128xf32>
    %cst = arith.constant dense<0.000000e+00> : vector<16x128xf32>
    %3 = tpu.matmul %1, %2, %cst {dimension_numbers = #tpu.dot_dimension_numbers<[1], [0], [0], [1], [0, 0, 1, 1], [], []>} : vector<16x8xf32>, vector<8x128xf32>, vector<16x128xf32> -> vector<16x128xf32>
    %4 = vector.extract_strided_slice %0 {offsets = [0, 0], sizes = [1, 128], strides = [1, 1]} : vector<4x128xf32> to vector<1x128xf32>
    %5 = vector.broadcast %4 : vector<1x128xf32> to vector<16x128xf32>
    %6 = arith.addf %3, %5 : vector<16x128xf32>
    %c0_5 = arith.constant 0 : index
    %c0_6 = arith.constant 0 : index
    %7 = vector.load %arg6[%c0_5, %c0_6] : memref<16x128xf32, #tpu.memory_space<vmem>>, vector<16x128xf32>
    tpu.vector_store %arg6[%c0_5, %c0_6], %6 {strides = array<i32>} : memref<16x128xf32, #tpu.memory_space<vmem>>, vector<16x128xf32>,
    %c0_7 = arith.constant 0 : index
    %c0_8 = arith.constant 0 : index
    %8 = vector.load %arg6[%c0_7, %c0_8] : memref<16x128xf32, #tpu.memory_space<vmem>>, vector<10x128xf32>
    %c0_9 = arith.constant 0 : index
    %c0_10 = arith.constant 0 : index
    %c0_11 = arith.constant 0 : index
    %9 = vector.load %arg3[%c0_9, %c0_10, %c0_11] : memref<6x128x128xf32, #tpu.memory_space<vmem>>, vector<1x128x128xf32>
    %10 = vector.shape_cast %9 : vector<1x128x128xf32> to vector<128x128xf32>
    %cst_12 = arith.constant dense<0.000000e+00> : vector<10x128xf32>
    %11 = tpu.matmul %8, %10, %cst_12 {dimension_numbers = #tpu.dot_dimension_numbers<[1], [0], [0], [1], [0, 0, 1, 1], [], []>} : vector<10x128xf32>, vector<128x128xf32>, vector<10x128xf32> -> vector<10x128xf32>
    %c1 = arith.constant 1 : index
    %c0_13 = arith.constant 0 : index
    %12 = vector.load %arg6[%c1, %c0_13] : memref<16x128xf32, #tpu.memory_space<vmem>>, vector<10x128xf32>
    %c1_14 = arith.constant 1 : index
    %c0_15 = arith.constant 0 : index
    %c0_16 = arith.constant 0 : index
    %13 = vector.load %arg3[%c1_14, %c0_15, %c0_16] : memref<6x128x128xf32, #tpu.memory_space<vmem>>, vector<1x128x128xf32>
    %14 = vector.shape_cast %13 : vector<1x128x128xf32> to vector<128x128xf32>
    %cst_17 = arith.constant dense<0.000000e+00> : vector<10x128xf32>
    %15 = tpu.matmul %12, %14, %cst_17 {dimension_numbers = #tpu.dot_dimension_numbers<[1], [0], [0], [1], [0, 0, 1, 1], [], []>} : vector<10x128xf32>, vector<128x128xf32>, vector<10x128xf32> -> vector<10x128xf32>
    %16 = arith.addf %11, %15 : vector<10x128xf32>
    %17 = vector.extract_strided_slice %0 {offsets = [1, 0], sizes = [1, 128], strides = [1, 1]} : vector<4x128xf32> to vector<1x128xf32>
    %18 = vector.broadcast %17 : vector<1x128xf32> to vector<10x128xf32>
    %19 = arith.addf %16, %18 : vector<10x128xf32>
    %c0_18 = arith.constant 0 : index
    %c0_19 = arith.constant 0 : index
    %20 = vector.load %arg7[%c0_18, %c0_19] : memref<16x128xf32, #tpu.memory_space<vmem>>, vector<10x128xf32>
    tpu.vector_store %arg7[%c0_18, %c0_19], %19 {strides = array<i32>} : memref<16x128xf32, #tpu.memory_space<vmem>>, vector<10x128xf32>,
    %c0_20 = arith.constant 0 : index
    %c0_21 = arith.constant 0 : index
    %21 = vector.load %arg7[%c0_20, %c0_21] : memref<16x128xf32, #tpu.memory_space<vmem>>, vector<9x128xf32>
    %c2 = arith.constant 2 : index
    %c0_22 = arith.constant 0 : index
    %c0_23 = arith.constant 0 : index
    %22 = vector.load %arg3[%c2, %c0_22, %c0_23] : memref<6x128x128xf32, #tpu.memory_space<vmem>>, vector<1x128x128xf32>
    %23 = vector.shape_cast %22 : vector<1x128x128xf32> to vector<128x128xf32>
    %cst_24 = arith.constant dense<0.000000e+00> : vector<9x128xf32>
    %24 = tpu.matmul %21, %23, %cst_24 {dimension_numbers = #tpu.dot_dimension_numbers<[1], [0], [0], [1], [0, 0, 1, 1], [], []>} : vector<9x128xf32>, vector<128x128xf32>, vector<9x128xf32> -> vector<9x128xf32>
    %c1_25 = arith.constant 1 : index
    %c0_26 = arith.constant 0 : index
    %25 = vector.load %arg7[%c1_25, %c0_26] : memref<16x128xf32, #tpu.memory_space<vmem>>, vector<9x128xf32>
    %c3 = arith.constant 3 : index
    %c0_27 = arith.constant 0 : index
    %c0_28 = arith.constant 0 : index
    %26 = vector.load %arg3[%c3, %c0_27, %c0_28] : memref<6x128x128xf32, #tpu.memory_space<vmem>>, vector<1x128x128xf32>
    %27 = vector.shape_cast %26 : vector<1x128x128xf32> to vector<128x128xf32>
    %cst_29 = arith.constant dense<0.000000e+00> : vector<9x128xf32>
    %28 = tpu.matmul %25, %27, %cst_29 {dimension_numbers = #tpu.dot_dimension_numbers<[1], [0], [0], [1], [0, 0, 1, 1], [], []>} : vector<9x128xf32>, vector<128x128xf32>, vector<9x128xf32> -> vector<9x128xf32>
    %29 = arith.addf %24, %28 : vector<9x128xf32>
    %30 = vector.extract_strided_slice %0 {offsets = [2, 0], sizes = [1, 128], strides = [1, 1]} : vector<4x128xf32> to vector<1x128xf32>
    %31 = vector.broadcast %30 : vector<1x128xf32> to vector<9x128xf32>
    %32 = arith.addf %29, %31 : vector<9x128xf32>
    %c0_30 = arith.constant 0 : index
    %c0_31 = arith.constant 0 : index
    %33 = vector.load %arg6[%c0_30, %c0_31] : memref<16x128xf32, #tpu.memory_space<vmem>>, vector<9x128xf32>
    tpu.vector_store %arg6[%c0_30, %c0_31], %32 {strides = array<i32>} : memref<16x128xf32, #tpu.memory_space<vmem>>, vector<9x128xf32>,
    %c0_32 = arith.constant 0 : index
    %c0_33 = arith.constant 0 : index
    %34 = vector.load %arg6[%c0_32, %c0_33] : memref<16x128xf32, #tpu.memory_space<vmem>>, vector<8x128xf32>
    %c4 = arith.constant 4 : index
    %c0_34 = arith.constant 0 : index
    %c0_35 = arith.constant 0 : index
    %35 = vector.load %arg3[%c4, %c0_34, %c0_35] : memref<6x128x128xf32, #tpu.memory_space<vmem>>, vector<1x128x128xf32>
    %36 = vector.shape_cast %35 : vector<1x128x128xf32> to vector<128x128xf32>
    %cst_36 = arith.constant dense<0.000000e+00> : vector<8x128xf32>
    %37 = tpu.matmul %34, %36, %cst_36 {dimension_numbers = #tpu.dot_dimension_numbers<[1], [0], [0], [1], [0, 0, 1, 1], [], []>} : vector<8x128xf32>, vector<128x128xf32>, vector<8x128xf32> -> vector<8x128xf32>
    %c1_37 = arith.constant 1 : index
    %c0_38 = arith.constant 0 : index
    %38 = vector.load %arg6[%c1_37, %c0_38] : memref<16x128xf32, #tpu.memory_space<vmem>>, vector<8x128xf32>
    %c5 = arith.constant 5 : index
    %c0_39 = arith.constant 0 : index
    %c0_40 = arith.constant 0 : index
    %39 = vector.load %arg3[%c5, %c0_39, %c0_40] : memref<6x128x128xf32, #tpu.memory_space<vmem>>, vector<1x128x128xf32>
    %40 = vector.shape_cast %39 : vector<1x128x128xf32> to vector<128x128xf32>
    %cst_41 = arith.constant dense<0.000000e+00> : vector<8x128xf32>
    %41 = tpu.matmul %38, %40, %cst_41 {dimension_numbers = #tpu.dot_dimension_numbers<[1], [0], [0], [1], [0, 0, 1, 1], [], []>} : vector<8x128xf32>, vector<128x128xf32>, vector<8x128xf32> -> vector<8x128xf32>
    %42 = arith.addf %37, %41 : vector<8x128xf32>
    %43 = vector.extract_strided_slice %0 {offsets = [3, 0], sizes = [1, 128], strides = [1, 1]} : vector<4x128xf32> to vector<1x128xf32>
    %44 = vector.broadcast %43 : vector<1x128xf32> to vector<8x128xf32>
    %45 = arith.addf %42, %44 : vector<8x128xf32>
    %c0_42 = arith.constant 0 : index
    %c0_43 = arith.constant 0 : index
    %46 = vector.load %arg5[%c0_42, %c0_43] : memref<8x128xf32, #tpu.memory_space<vmem>>, vector<8x128xf32>
    tpu.vector_store %arg5[%c0_42, %c0_43], %45 {strides = array<i32>} : memref<8x128xf32, #tpu.memory_space<vmem>>, vector<8x128xf32>,
    return
  }
  func.func @transform_0(%arg0: i32) -> (i32, i32) {
    %c0_i32 = arith.constant 0 : i32
    %c0_i32_0 = arith.constant 0 : i32
    return %arg0, %c0_i32 : i32, i32
  }
  func.func @transform_1(%arg0: i32) -> (i32, i32) {
    %c0_i32 = arith.constant 0 : i32
    %c0_i32_0 = arith.constant 0 : i32
    %c0_i32_1 = arith.constant 0 : i32
    return %c0_i32, %c0_i32_0 : i32, i32
  }
  func.func @transform_2(%arg0: i32) -> (i32, i32, i32) {
    %c0_i32 = arith.constant 0 : i32
    %c0_i32_0 = arith.constant 0 : i32
    %c0_i32_1 = arith.constant 0 : i32
    %c0_i32_2 = arith.constant 0 : i32
    return %c0_i32, %c0_i32_0, %c0_i32_1 : i32, i32, i32
  }
  func.func @transform_3(%arg0: i32) -> (i32, i32) {
    %c0_i32 = arith.constant 0 : i32
    %c0_i32_0 = arith.constant 0 : i32
    %c0_i32_1 = arith.constant 0 : i32
    return %c0_i32, %c0_i32_0 : i32, i32
  }
  func.func @transform_4(%arg0: i32) -> (i32, i32) {
    %c0_i32 = arith.constant 0 : i32
    %c0_i32_0 = arith.constant 0 : i32
    return %arg0, %c0_i32 : i32, i32
  }
}

</mosaic_0001>

<bundles_post_ra>
// kernel: tpu_custom_call.1
= control target key start
LH: loop header
LB: loop body
LE: loop exit
PB: predicated region body
PF: predicated region fallthrough
CT: control target
= control target key end

     0   :  { %9 = vsyncpa [#allocation5], 0  ;;  %s1833_s0 = inlined_call_operand.vmem [shape: f32[32,8], index: 0, kind: input, shape index: {}]   ;;  %s1834_s1 = inlined_call_operand.vmem [shape: f32[8,128], index: 1, kind: input, shape index: {}]   ;;  %s1835_s2 = inlined_call_operand.hbm [shape: f32[6,128,128], index: 2, kind: input, shape index: {}]   ;;  %s1836_s3 = inlined_call_operand.vmem [shape: f32[4,128], index: 3, kind: input, shape index: {}]   ;;  %s1837_s4 = inlined_call_operand.hbm [shape: f32[16,128], index: 4, kind: output, shape index: {}]  }
   0x1   :  { %10 = vsyncpa [#allocation6], 0 }
   0x2   :  { %12 = vsyncpa [#allocation6 + $0x1], 0  ;;  %s1665_s15 = smov 0   ;;  %s1667_s16 = smov 0  }
   0x3   :  { %s1669_s17 = smov 0   ;;  %s1671_s18 = smov 0  }
   0x4 LB: > { %s1686_s19 = sadd.s32 4294967295, %s1631_s18   ;;  %s963_s20 = sadd.s32 4294967294, %s1631_s18   ;;  %s1631_s18 = sphi %s1671_s18, %s1853_s18   ;;  %s1627_s17 = sphi %s1669_s17, %s1852_s17   ;;  %s1623_s16 = sphi %s1667_s16, %s1851_s16   ;;  %s1619_s15 = sphi %s1665_s15, %s1850_s15  }
   0x5   : > { %s1690_s21 = sadd.s32 1, %s1631_s18   ;;  %s114_s22 = sadd.s32 1, %s1627_s17 }
   0x6   : > { %s111_s23 = ssub.s32 %s1631_s18, %s1690_s21  ;;  %p124_p0 = scmp.ne.s32.totalorder %s1627_s17, %s1623_s16 }
   0x7   : > { %p112_p1 = scmp.eq.s32.totalorder %s111_s23, 0  ;;  %p125_p2 = scmp.eq.s32.totalorder %s1686_s19, 1 }
   0x8   : > { %p130_p3 = scmp.ne.s32.totalorder %s1623_s16, %s1619_s15  ;;  %p131_p4 = scmp.eq.s32.totalorder %s963_s20, 1 }
   0x9   : > { %s1701_s24 = scalar_select %p112_p1, %s1627_s17, %s114_s22  }
   0xa   : > { %p1703_p5 = por %p125_p2, %p124_p0  ;;  %p1707_p6 = por %p131_p4, %p130_p3 }
   0xb   : > { %p964_p7 = scmp.ge.s32.totalorder %s1631_s18, 1  ;;  %p138_p8 = scmp.lt.s32.totalorder %s1631_s18, 3 }
   0xc   : > { %s1841_s25 = scalar_select %p1703_p5, 1, 0 }
   0xd   : > { %s1842_s26 = scalar_select %p1707_p6, 1, 0 }
   0xe   : > { %p1838_p9 = scmp.eq.s32.totalorder %s1686_s19, 0  ;;  %p1714_p10 = pnand %p964_p7, %p138_p8 }
   0xf   : > { %s1633_s28 = smov [#allocation4]   ;;  %s1537_s7 = scalar_lea.hbm %s1835_s2, 12288 }
  0x10   : > { %s1843_s27 = scalar_select %p1714_p10, 1, 0 }
  0x11   : > { %s153_s29 = sshll.u32 %s1633_s28, 4  ;;  %p1488_p11 = pneg %p1714_p10  ;;  %s154_s29 = int_to_ptr.vmem [resolvable:$true] %s153_s29 }
  0x12   : > { %p1538_p13 = scmp.ne.s32.totalorder %s1835_s2, %s1537_s7  ;;  %p1544_p3 = scmp.lt.u32.totalorder %s1537_s7, %s1835_s2 }
  0x13   : > { %p1722_p12 = pnand %p1838_p9, %p1488_p11 }
  0x15   : > { %p1539_p0 = pneg %p1722_p12 }
  0x17   : > { %p1540_p1 = pnand %p1539_p0, %p1538_p13 }
  0x19   : > { %p1541_p2 = pneg %p1540_p1 }
  0x1b   : > { %p1546_p4 = pnand %p1544_p3, %p1541_p2 }
  0x1d   : > { %1549 = shalt.err (!%p1546_p4)
}
  0x1e   : > { %s1550_s12 = scalar_lea.vmem %s154_s29, 12288  ;;  %p1558_p9 = scmp.lt.s32.totalorder %s154_s29, %s154_s29 }
  0x1f   : > { %p1551_p7 = scmp.ne.s32.totalorder %s154_s29, %s1550_s12  ;;  %p1559_p6 = scmp.lt.s32.totalorder %s1550_s12, %s1550_s12 }
  0x21   : > { %p1553_p8 = pnand %p1551_p7, %p1539_p0  ;;  %p1560_p5 = por %p1559_p6, %p1558_p9 }
  0x23   : > { %p1554_p11 = pneg %p1553_p8 }
  0x25   : > { %p1561_p10 = pnand %p1560_p5, %p1554_p11 }
  0x27   : > { %1564 = shalt.err (!%p1561_p10)
}
  0x28   : > { %s1634_s13 = smov 128   ;;  %s1635_s14 = smov 8  }
  0x29   : > { %1491 = dma.hbm_to_vmem [thread:$0]  (!%p1722_p12), %s1835_s2, 12288, %s154_s29, [#allocation5], %s1634_s13, %s1634_s13, %s1635_s14  }
  0x2a   : > { %p1845_p13 = scmp.ne.s32.totalorder %s1843_s27, 0 }
  0x2b   : > { %p1846_p1 = scmp.eq.s32.totalorder (!%p1845_p13), %s1686_s19, 0 }
  0x2c   : > { %181 = sbr.rel (%p1845_p13) target bundleno = 1025 (0x401), region = 36 }
  0x33   : > { %1610 = dma.done.wait (%p1846_p1), [#allocation5], 12288   ;;  %p1847_p0 = pmov %p1846_p1 }
  0x34   : > { %s970_s23 = sshll.u32 %s1686_s19, 1  ;;  %vm221_vm0 = vcmask 64512   ;;  %v216_v0 = vld [vmem:[%s1834_s1] sm:$0xff]  ;;  %v326_v3 = vld [vmem:[#allocation4 + $0x80] sm:$0xff]  ;;  %v327_v4 = vld [vmem:[#allocation4 + $0x88] sm:$0xff]  ;;  %v217_v45 = vlaneseq  ;;  %vm1637_vm1 = vmmov 0  }
  0x35   : > { %1612 = vsyncadd (%p1847_p0), [#allocation5], 4294955008  ;;  %p208_p5 = scmp.lt.s32.totalorder %s970_s23, 3  ;;  %1087 = vmatprep.subr.mxu0 %v216_v0  ;;  %v328_v5 = vld [vmem:[#allocation4 + $0x90] sm:$0xff]  ;;  %v1302_v6 = vpack.c.bf16 %v327_v4, %v326_v3  ;;  %v329_v7 = vld [vmem:[#allocation4 + $0x98] sm:$0xff]  ;;  %s204_s9 = sand.u32 1, %s1623_s16  }
  0x36   : > { %1088 = vmatpush3.msra.mxu0 %v216_v0  ;;  %v1306_v8 = vpack.c.bf16 %v329_v7, %v328_v5  ;;  %v330_v9 = vld [vmem:[#allocation4 + $0xa0] sm:$0xff]  ;;  %v331_v10 = vld [vmem:[#allocation4 + $0xa8] sm:$0xff]  ;;  %v332_v12 = vld [vmem:[#allocation4 + $0xb0] sm:$0xff]  ;;  %v1755_v46 = vshrl.u32 %v217_v45, 7  ;;  %s969_s10 = sshll.u32 %s204_s9, 3  ;;  %s975_s11 = sshll.u32 %s1686_s19, 7 }
  0x37   : > { %s1855_s23 = smov (!%p208_p5, %s970_s23), 3  ;;  %1303 = vmatprep.subr.bf16.mxu1 %v1302_v6  ;;  %v1310_v11 = vpack.c.bf16 %v331_v10, %v330_v9  ;;  %v333_v13 = vld [vmem:[#allocation4 + $0xb8] sm:$0xff]  ;;  %v334_v15 = vld [vmem:[#allocation4 + $0xc0] sm:$0xff]  ;;  %v335_v16 = vld [vmem:[#allocation4 + $0xc8] sm:$0xff]  ;;  %s206_s12 = scalar_lea.vmem [#allocation7], %s969_s10 }
  0x38   : > { %s971_s28 = sshll.u32 %s1855_s23, 3  ;;  %1305 = vmatpush3.bf16.msra.mxu1 %v1302_v6  ;;  %v1314_v14 = vpack.c.bf16 %v333_v13, %v332_v12  ;;  %v1318_v17 = vpack.c.bf16 %v335_v16, %v334_v15  ;;  %v336_v18 = vld [vmem:[#allocation4 + $0xd0] sm:$0xff]  ;;  %v337_v19 = vld [vmem:[#allocation4 + $0xd8] sm:$0xff]  ;;  %v338_v21 = vld [vmem:[#allocation4 + $0xe0] sm:$0xff]  ;;  %v219_v47 = vsub.s32 0, %v1755_v46  ;;  %s892_s13 = sshll.u32 %s206_s12, 4  ;;  %s1793_s13 = int_to_ptr.vmem [resolvable:$true] %s892_s13 }
  0x39   : > { %s211_s6 = scalar_lea.vmem %s1833_s0, %s971_s28  ;;  %1307 = vmatprep.subr.bf16.mxu1 %v1306_v8  ;;  %v1322_v20 = vpack.c.bf16 %v337_v19, %v336_v18  ;;  %v339_v22 = vld [vmem:[#allocation4 + $0xe8] sm:$0xff]  ;;  %v340_v24 = vld [vmem:[#allocation4 + $0xf0] sm:$0xff]  ;;  %v341_v25 = vld [vmem:[#allocation4 + $0xf8] sm:$0xff]  ;;  %s1791_s22 = scalar_lea.hbm %s1837_s4, %s975_s11 }
  0x3a   : > { %v214_v1 = vld [vmem:[%s211_s6] sm:$0xff]  ;;  %v215_v2 = vld [vmem:[%s211_s6 + $0x8] sm:$0xff]  ;;  %v1326_v23 = vpack.c.bf16 %v339_v22, %v338_v21  ;;  %v1330_v26 = vpack.c.bf16 %v341_v25, %v340_v24  ;;  %v308_v28 = vld [vmem:[#allocation4 + $0x8] sm:$0xff]  ;;  %s879_s23 = scalar_lea.sflag [#allocation6], %s204_s9  ;;  %s1565_s28 = scalar_lea.vmem %s1793_s13, 128 }
  0x3b   : > { %1089 = vmatprep.mubr.msk.f32.mxu0 %vm221_vm0, %v214_v1  ;;  %v307_v27 = vld [vmem:[#allocation4] sm:$0xff]  ;;  %v523_v31 = vld [vmem:[#allocation4 + $0x188] sm:$0xff]  ;;  %v524_v32 = vld [vmem:[#allocation4 + $0x190] sm:$0xff]  ;;  %p1566_p6 = scmp.ne.s32.totalorder %s1793_s13, %s1565_s28  ;;  %p1848_p9 = scmp.ne.s32.totalorder %s1841_s25, 0 }
  0x3c   : > { %1090 = vmatmul.mubr.msk.f32.vlgmr.msra.gmra.mrb[0].mxu0 %vm221_vm0, %v215_v2  ;;  %1309 = vmatpush3.bf16.msra.mxu1 %v1306_v8  ;;  %v1334_v29 = vpack.c.bf16 %v308_v28, %v307_v27  ;;  %v522_v30 = vld [vmem:[#allocation4 + $0x180] sm:$0xff]  ;;  %v525_v34 = vld [vmem:[#allocation4 + $0x198] sm:$0xff]  ;;  %v527_v37 = vld [vmem:[#allocation4 + $0x1a8] sm:$0xff]  ;;  %v1636_v28 = vmov 0.0|0.0   ;;  %s1639_s19 = smov [#allocation7]  }
  0x3d   : > { %1311 = vmatprep.subr.bf16.mxu1 %v1310_v11  ;;  %v1366_v33 = vpack.c.bf16 %v523_v31, %v522_v30  ;;  %v1370_v35 = vpack.c.bf16 %v525_v34, %v524_v32  ;;  %v526_v36 = vld [vmem:[#allocation4 + $0x1a0] sm:$0xff]  ;;  %v528_v39 = vld [vmem:[#allocation4 + $0x1b0] sm:$0xff]  ;;  %v529_v40 = vld [vmem:[#allocation4 + $0x1b8] sm:$0xff]  ;;  %p1567_p10 = pnand %p1566_p6, %p1848_p9  ;;  %s1569_s30 = sshll.u32 %s1639_s19, 4  ;;  %s1570_s30 = int_to_ptr.vmem [resolvable:$false] %s1569_s30 }
  0x3e   : > { %v1374_v38 = vpack.c.bf16 %v527_v37, %v526_v36  ;;  %v1378_v41 = vpack.c.bf16 %v529_v40, %v528_v39  ;;  %v530_v42 = vld [vmem:[#allocation4 + $0x1c0] sm:$0xff]  ;;  %v531_v43 = vld [vmem:[#allocation4 + $0x1c8] sm:$0xff]  ;;  %v1761_v48 = vld [vmem:[%s1836_s3] sm:$0xf]  ;;  %s1571_s5 = scalar_lea.vmem %s1570_s30, 256  ;;  %p1572_p2 = scmp.lt.s32.totalorder %s1793_s13, %s1570_s30 }
  0x3f   : > { %1367 = vmatprep.subr.bf16.mxu0 %v1366_v33  ;;  %v1382_v44 = vpack.c.bf16 %v531_v43, %v530_v42  ;;  %v220_v49 = vrot.slane %v1761_v48, %v219_v47  ;;  %v309_v54 = vld [vmem:[#allocation4 + $0x10] sm:$0xff]  ;;  %v310_v55 = vld [vmem:[#allocation4 + $0x18] sm:$0xff]  ;;  %v311_v59 = vld [vmem:[#allocation4 + $0x20] sm:$0xff]  ;;  %v494_v42 = vsub.s32 1, %v1755_v46  ;;  %p1568_p12 = pneg %p1567_p10  ;;  %p1573_p3 = scmp.lt.s32.totalorder %s1571_s5, %s1565_s28 }
  0x40   : > { %1313 = vmatpush3.bf16.msra.mxu1 %v1310_v11  ;;  %1369 = vmatpush3.bf16.msra.mxu0 %v1366_v33  ;;  %v1338_v57 = vpack.c.bf16 %v310_v55, %v309_v54  ;;  %v312_v60 = vld [vmem:[#allocation4 + $0x28] sm:$0xff]  ;;  %v313_v62 = vld [vmem:[#allocation4 + $0x30] sm:$0xff]  ;;  %v314_v63 = vld [vmem:[#allocation4 + $0x38] sm:$0xff] }
  0x41   : > { %1315 = vmatprep.subr.bf16.mxu1 %v1314_v14  ;;  %1371 = vmatprep.subr.bf16.mxu0 %v1370_v35  ;;  %v1342_v61 = vpack.c.bf16 %v312_v60, %v311_v59  ;;  %v1346_v0 = vpack.c.bf16 %v314_v63, %v313_v62  ;;  %v315_v1 = vld [vmem:[#allocation4 + $0x40] sm:$0xff]  ;;  %v316_v2 = vld [vmem:[#allocation4 + $0x48] sm:$0xff]  ;;  %v317_v4 = vld [vmem:[#allocation4 + $0x50] sm:$0xff]  ;;  %v495_v43 = vrot.slane %v1761_v48, %v494_v42  ;;  %p1574_p4 = por %p1573_p3, %p1572_p2 }
  0x42   : > { %v1350_v3 = vpack.c.bf16 %v316_v2, %v315_v1  ;;  %v318_v5 = vld [vmem:[#allocation4 + $0x58] sm:$0xff]  ;;  %v319_v7 = vld [vmem:[#allocation4 + $0x60] sm:$0xff]  ;;  %v320_v8 = vld [vmem:[#allocation4 + $0x68] sm:$0xff] }
  0x43   : > { %v1354_v6 = vpack.c.bf16 %v318_v5, %v317_v4  ;;  %v1358_v9 = vpack.c.bf16 %v320_v8, %v319_v7  ;;  %v321_v10 = vld [vmem:[#allocation4 + $0x70] sm:$0xff]  ;;  %v322_v11 = vld [vmem:[#allocation4 + $0x78] sm:$0xff]  ;;  %v535_v18 = vld [vmem:[#allocation4 + $0x1e8] sm:$0xff]  ;;  %p1575_p7 = pnand %p1574_p4, %p1568_p12 }
  0x44   : > { %1317 = vmatpush3.bf16.msra.mxu1 %v1314_v14  ;;  %1373 = vmatpush3.bf16.msra.mxu0 %v1370_v35  ;;  %v1362_v12 = vpack.c.bf16 %v322_v11, %v321_v10  ;;  %v532_v14 = vld [vmem:[#allocation4 + $0x1d0] sm:$0xff]  ;;  %v533_v15 = vld [vmem:[#allocation4 + $0x1d8] sm:$0xff]  ;;  %v504_v24 = vld [vmem:[#allocation4 + $0x108] sm:$0xff] }
  0x45   : > { %1319 = vmatprep.subr.bf16.mxu1 %v1318_v17  ;;  %1375 = vmatprep.subr.bf16.mxu0 %v1374_v38  ;;  %v1386_v16 = vpack.c.bf16 %v533_v15, %v532_v14  ;;  %v537_v21 = vld [vmem:[#allocation4 + $0x1f8] sm:$0xff]  ;;  %v717_v27 = vld [vmem:[#allocation4 + $0x288] sm:$0xff]  ;;  %v718_v30 = vld [vmem:[#allocation4 + $0x290] sm:$0xff] }
  0x46   : > { %v719_v31 = vld [vmem:[#allocation4 + $0x298] sm:$0xff]  ;;  %v720_v33 = vld [vmem:[#allocation4 + $0x2a0] sm:$0xff]  ;;  %v721_v34 = vld [vmem:[#allocation4 + $0x2a8] sm:$0xff] }
  0x47   : > { %v1434_v32 = vpack.c.bf16 %v719_v31, %v718_v30  ;;  %v1437_v35 = vpack.c.bf16 %v721_v34, %v720_v33  ;;  %v722_v36 = vld [vmem:[#allocation4 + $0x2b0] sm:$0xff]  ;;  %v723_v37 = vld [vmem:[#allocation4 + $0x2b8] sm:$0xff]  ;;  %v724_v39 = vld [vmem:[#allocation4 + $0x2c0] sm:$0xff] }
  0x48   : > { %1321 = vmatpush3.bf16.msra.mxu1 %v1318_v17  ;;  %1377 = vmatpush3.bf16.msra.mxu0 %v1374_v38  ;;  %v534_v17 = vld [vmem:[#allocation4 + $0x1e0] sm:$0xff]  ;;  %v1440_v38 = vpack.c.bf16 %v723_v37, %v722_v36  ;;  %v725_v40 = vld [vmem:[#allocation4 + $0x2c8] sm:$0xff]  ;;  %v510_v59 = vld [vmem:[#allocation4 + $0x138] sm:$0xff] }
  0x49   : > { %1323 = vmatprep.subr.bf16.mxu1 %v1322_v20  ;;  %1379 = vmatprep.subr.bf16.mxu0 %v1378_v41  ;;  %v1390_v19 = vpack.c.bf16 %v535_v18, %v534_v17  ;;  %v507_v55 = vld [vmem:[#allocation4 + $0x120] sm:$0xff]  ;;  %v512_v62 = vld [vmem:[#allocation4 + $0x148] sm:$0xff]  ;;  %v514_v1 = vld [vmem:[#allocation4 + $0x158] sm:$0xff] }
  0x4a   : > { %v516_v4 = vld [vmem:[#allocation4 + $0x168] sm:$0xff]  ;;  %v518_v7 = vld [vmem:[#allocation4 + $0x178] sm:$0xff]  ;;  %v712_v34 = vld [vmem:[#allocation4 + $0x270] sm:$0xff] }
  0x4b   : > { %v699_v10 = vld [vmem:[#allocation4 + $0x208] sm:$0xff]  ;;  %v727_v33 = vld [vmem:[#allocation4 + $0x2d8] sm:$0xff]  ;;  %v730_v42 = vld [vmem:[#allocation4 + $0x2f0] sm:$0xff] }
  0x4c   : > { %1325 = vmatpush3.bf16.msra.mxu1 %v1322_v20  ;;  %1381 = vmatpush3.bf16.msra.mxu0 %v1378_v41  ;;  %v536_v20 = vld [vmem:[#allocation4 + $0x1f0] sm:$0xff]  ;;  %v1443_v41 = vpack.c.bf16 %v725_v40, %v724_v39  ;;  %v703_v17 = vld [vmem:[#allocation4 + $0x228] sm:$0xff]  ;;  %v713_v36 = vld [vmem:[#allocation4 + $0x278] sm:$0xff] }
  0x4d   : > { %1327 = vmatprep.subr.bf16.mxu1 %v1326_v23  ;;  %1383 = vmatprep.subr.bf16.mxu0 %v1382_v44  ;;  %v1394_v22 = vpack.c.bf16 %v537_v21, %v536_v20  ;;  %v705_v20 = vld [vmem:[#allocation4 + $0x238] sm:$0xff]  ;;  %v711_v30 = vld [vmem:[#allocation4 + $0x268] sm:$0xff]  ;;  %v1476_v37 = vpack.c.bf16 %v713_v36, %v712_v34 }
  0x4e   : > { %v729_v39 = vld [vmem:[#allocation4 + $0x2e8] sm:$0xff] }
  0x50   : > { %1329 = vmatpush3.bf16.msra.mxu1 %v1326_v23  ;;  %1385 = vmatpush3.bf16.msra.mxu0 %v1382_v44  ;;  %v503_v23 = vld [vmem:[#allocation4 + $0x100] sm:$0xff] }
  0x51   : > { %1331 = vmatprep.subr.bf16.mxu1 %v1330_v26  ;;  %1387 = vmatprep.subr.bf16.mxu0 %v1386_v16  ;;  %v1398_v25 = vpack.c.bf16 %v504_v24, %v503_v23  ;;  %v707_v23 = vld [vmem:[#allocation4 + $0x248] sm:$0xff] }
  0x54   : > { %1333 = vmatpush3.bf16.msra.mxu1 %v1330_v26  ;;  %1389 = vmatpush3.bf16.msra.mxu0 %v1386_v16  ;;  %v716_v26 = vld [vmem:[#allocation4 + $0x280] sm:$0xff] }
  0x55   : > { %1335 = vmatprep.subr.bf16.mxu1 %v1334_v29  ;;  %1391 = vmatprep.subr.bf16.mxu0 %v1390_v19  ;;  %v702_v16 = vld [vmem:[#allocation4 + $0x220] sm:$0xff] }
  0x56   : > { %v1461_v18 = vpack.c.bf16 %v703_v17, %v702_v16 }
  0x58   : > { %1393 = vmatpush3.bf16.msra.mxu0 %v1390_v19  ;;  %v704_v19 = vld [vmem:[#allocation4 + $0x230] sm:$0xff] }
  0x59   : > { %1395 = vmatprep.subr.bf16.mxu0 %v1394_v22  ;;  %v1464_v21 = vpack.c.bf16 %v705_v20, %v704_v19 }
  0x5c   : > { %1397 = vmatpush3.bf16.msra.mxu0 %v1394_v22  ;;  %v706_v22 = vld [vmem:[#allocation4 + $0x240] sm:$0xff] }
  0x5d   : > { %1399 = vmatprep.subr.bf16.mxu0 %v1398_v25  ;;  %v1467_v24 = vpack.c.bf16 %v707_v23, %v706_v22 }
 0x10f   : > { %v1091_v50 = vpop.f32.mrb[0].mxu0 }
 0x110   : > { %v300_v51 = vadd.f32 %v1091_v50, %v220_v49  ;;  %v294_v52 = vpop.f32.mrb[1].mxu0  ;;  %v505_v50 = vld [vmem:[#allocation4 + $0x110] sm:$0xff] }
 0x111   : > { %v295_v53 = vadd.f32 %v294_v52, %v220_v49 }
 0x112   : > { %304 = vst [vmem:[#allocation2 + $0x8] sm:$0xff] %v300_v51  ;;  %v506_v51 = vld [vmem:[#allocation4 + $0x118] sm:$0xff] }
 0x113   : > { %303 = vst [vmem:[#allocation2] sm:$0xff] %v295_v53 }
 0x119   : > { %v324_v58 = vld [vmem:[#allocation2 + $0x9] sm:$0x3] }
 0x11a   : > { %v323_v56 = vld [vmem:[#allocation2 + $0x1] sm:$0xff] }
 0x11b   : > { %1124 = vmatprep.mubr.f32.mxu1 %v323_v56  ;;  %v306_v13 = vld [vmem:[#allocation2 + $0x8] sm:$0x3] }
 0x11c   : > { %1125 = vmatmul.mubr.f32.vlgmr.msra.gmra.mrb[0].mxu1 %v324_v58  ;;  %v508_v56 = vld [vmem:[#allocation4 + $0x128] sm:$0xff]  ;;  %v509_v58 = vld [vmem:[#allocation4 + $0x130] sm:$0xff] }
 0x11d   : > { %1337 = vmatpush3.bf16.msra.mxu1 %v1334_v29  ;;  %1159 = vmatprep.mubr.f32.mxu1 %v295_v53  ;;  %v1431_v29 = vpack.c.bf16 %v717_v27, %v716_v26  ;;  %v1402_v53 = vpack.c.bf16 %v506_v51, %v505_v50  ;;  %v1410_v60 = vpack.c.bf16 %v510_v59, %v509_v58  ;;  %v709_v26 = vld [vmem:[#allocation4 + $0x258] sm:$0xff] }
 0x11e   : > { %1339 = vmatprep.subr.bf16.mxu1 %v1338_v57 }
 0x121   : > { %1341 = vmatpush3.bf16.msra.mxu1 %v1338_v57  ;;  %v1406_v57 = vpack.c.bf16 %v508_v56, %v507_v55 }
 0x122   : > { %1343 = vmatprep.subr.bf16.mxu1 %v1342_v61 }
 0x125   : > { %1345 = vmatpush3.bf16.msra.mxu1 %v1342_v61  ;;  %v511_v61 = vld [vmem:[#allocation4 + $0x140] sm:$0xff] }
 0x126   : > { %1347 = vmatprep.subr.bf16.mxu1 %v1346_v0  ;;  %v1414_v63 = vpack.c.bf16 %v512_v62, %v511_v61 }
 0x129   : > { %1349 = vmatpush3.bf16.msra.mxu1 %v1346_v0  ;;  %v513_v0 = vld [vmem:[#allocation4 + $0x150] sm:$0xff] }
 0x12a   : > { %1351 = vmatprep.subr.bf16.mxu1 %v1350_v3  ;;  %v1418_v2 = vpack.c.bf16 %v514_v1, %v513_v0 }
 0x12d   : > { %1353 = vmatpush3.bf16.msra.mxu1 %v1350_v3  ;;  %v515_v3 = vld [vmem:[#allocation4 + $0x160] sm:$0xff] }
 0x12e   : > { %1355 = vmatprep.subr.bf16.mxu1 %v1354_v6  ;;  %v1422_v5 = vpack.c.bf16 %v516_v4, %v515_v3 }
 0x131   : > { %1357 = vmatpush3.bf16.msra.mxu1 %v1354_v6  ;;  %v517_v6 = vld [vmem:[#allocation4 + $0x170] sm:$0xff] }
 0x132   : > { %1359 = vmatprep.subr.bf16.mxu1 %v1358_v9  ;;  %v1426_v8 = vpack.c.bf16 %v518_v7, %v517_v6 }
 0x135   : > { %1361 = vmatpush3.bf16.msra.mxu1 %v1358_v9  ;;  %v698_v9 = vld [vmem:[#allocation4 + $0x200] sm:$0xff] }
 0x136   : > { %1363 = vmatprep.subr.bf16.mxu1 %v1362_v12  ;;  %v1455_v11 = vpack.c.bf16 %v699_v10, %v698_v9 }
 0x139   : > { %1365 = vmatpush3.bf16.msra.mxu1 %v1362_v12  ;;  %v700_v12 = vld [vmem:[#allocation4 + $0x210] sm:$0xff] }
 0x13a   : > { %1430 = vmatprep.subr.bf16.mxu1 %v1636_v28 }
 0x13c   : > { %1160 = vmatmul.mubr.f32.vlgmr.msra.gmra.mrb[0].mxu1 %v306_v13  ;;  %v701_v13 = vld [vmem:[#allocation4 + $0x218] sm:$0xff] }
 0x13d   : > { %1432 = vmatpush3.bf16.msra.mxu1 %v1431_v29  ;;  %v1458_v15 = vpack.c.bf16 %v701_v13, %v700_v12  ;;  %v710_v29 = vld [vmem:[#allocation4 + $0x260] sm:$0xff] }
 0x13e   : > { %1433 = vmatprep.subr.bf16.mxu1 %v1636_v28  ;;  %v1473_v31 = vpack.c.bf16 %v711_v30, %v710_v29 }
 0x141   : > { %1435 = vmatpush3.bf16.msra.mxu1 %v1434_v32  ;;  %v726_v32 = vld [vmem:[#allocation4 + $0x2d0] sm:$0xff] }
 0x142   : > { %1436 = vmatprep.subr.bf16.mxu1 %v1636_v28 }
 0x145   : > { %1438 = vmatpush3.bf16.msra.mxu1 %v1437_v35  ;;  %v1446_v35 = vpack.c.bf16 %v727_v33, %v726_v32 }
 0x146   : > { %1439 = vmatprep.subr.bf16.mxu1 %v1636_v28 }
 0x149   : > { %1441 = vmatpush3.bf16.msra.mxu1 %v1440_v38  ;;  %v728_v38 = vld [vmem:[#allocation4 + $0x2e0] sm:$0xff] }
 0x14a   : > { %1442 = vmatprep.subr.bf16.mxu1 %v1636_v28  ;;  %v1449_v40 = vpack.c.bf16 %v729_v39, %v728_v38 }
 0x14d   : > { %1444 = vmatpush3.bf16.msra.mxu1 %v1443_v41  ;;  %v1638_v41 = vmov 0.0  }
 0x14e   : > { %1445 = vmatprep.subr.bf16.mxu1 %v1636_v28  ;;  %1264 = vmatprep.mubr.msk.f32.mxu1 %vm1637_vm1, %v1638_v41 }
 0x151   : > { %1447 = vmatpush3.bf16.msra.mxu1 %v1446_v35 }
 0x152   : > { %1448 = vmatprep.subr.bf16.mxu1 %v1636_v28 }
 0x155   : > { %1450 = vmatpush3.bf16.msra.mxu1 %v1449_v40 }
 0x156   : > { %1451 = vmatprep.subr.bf16.mxu1 %v1636_v28 }
 0x20f   : > { %v1161_v44 = vpop.f32.mrb[0].mxu1 }
 0x210   : > { %v497_v45 = vadd.f32 %v1161_v44, %v495_v43  ;;  %v483_v47 = vpop.f32.mrb[1].mxu1 }
 0x211   : > { %v496_v49 = vadd.f32 %v495_v43, %v483_v47  ;;  %v731_v43 = vld [vmem:[#allocation4 + $0x2f8] sm:$0xff] }
 0x212   : > { %499 = vst [vmem:[#allocation3 + $0x8] sm:$0x3] %v497_v45  ;;  %v1452_v44 = vpack.c.bf16 %v731_v43, %v730_v42  ;;  %v690_v45 = vsub.s32 2, %v1755_v46 }
 0x213   : > { %498 = vst [vmem:[#allocation3] sm:$0xff] %v496_v49 }
 0x214   : > { %1453 = vmatpush3.bf16.msra.mxu1 %v1452_v44  ;;  %v691_v47 = vrot.slane %v1761_v48, %v690_v45 }
 0x219   : > { %v520_v54 = vld [vmem:[#allocation3 + $0x9] sm:$0x1]  ;;  %v501_v14 = vld [vmem:[#allocation3 + $0x8] sm:$0x1] }
 0x21a   : > { %v519_v52 = vld [vmem:[#allocation3 + $0x1] sm:$0xff] }
 0x21b   : > { %1194 = vmatprep.mubr.f32.mxu0 %v519_v52 }
 0x21c   : > { %1195 = vmatmul.mubr.f32.vlgmr.msra.gmra.mrb[2].mxu0 %v520_v54 }
 0x21d   : > { %1401 = vmatpush3.bf16.msra.mxu0 %v1398_v25  ;;  %1229 = vmatprep.mubr.f32.mxu0 %v496_v49  ;;  %v708_v25 = vld [vmem:[#allocation4 + $0x250] sm:$0xff] }
 0x21e   : > { %1403 = vmatprep.subr.bf16.mxu0 %v1402_v53  ;;  %v1470_v27 = vpack.c.bf16 %v709_v26, %v708_v25 }
 0x221   : > { %1405 = vmatpush3.bf16.msra.mxu0 %v1402_v53 }
 0x222   : > { %1407 = vmatprep.subr.bf16.mxu0 %v1406_v57 }
 0x225   : > { %1409 = vmatpush3.bf16.msra.mxu0 %v1406_v57 }
 0x226   : > { %1411 = vmatprep.subr.bf16.mxu0 %v1410_v60 }
 0x229   : > { %1413 = vmatpush3.bf16.msra.mxu0 %v1410_v60 }
 0x22a   : > { %1415 = vmatprep.subr.bf16.mxu0 %v1414_v63 }
 0x22d   : > { %1417 = vmatpush3.bf16.msra.mxu0 %v1414_v63 }
 0x22e   : > { %1419 = vmatprep.subr.bf16.mxu0 %v1418_v2 }
 0x231   : > { %1421 = vmatpush3.bf16.msra.mxu0 %v1418_v2 }
 0x232   : > { %1423 = vmatprep.subr.bf16.mxu0 %v1422_v5 }
 0x235   : > { %1425 = vmatpush3.bf16.msra.mxu0 %v1422_v5 }
 0x236   : > { %1427 = vmatprep.subr.bf16.mxu0 %v1426_v8 }
 0x239   : > { %1429 = vmatpush3.bf16.msra.mxu0 %v1426_v8 }
 0x23a   : > { %1454 = vmatprep.subr.bf16.mxu0 %v1636_v28 }
 0x23c   : > { %1230 = vmatmul.mubr.f32.vlgmr.msra.gmra.mrb[2].mxu0 %v501_v14 }
 0x23d   : > { %1456 = vmatpush3.bf16.msra.mxu0 %v1455_v11  ;;  %1299 = vmatprep.mubr.msk.f32.mxu0 %vm1637_vm1, %v1638_v41 }
 0x23e   : > { %1457 = vmatprep.subr.bf16.mxu0 %v1636_v28 }
 0x241   : > { %1459 = vmatpush3.bf16.msra.mxu0 %v1458_v15 }
 0x242   : > { %1460 = vmatprep.subr.bf16.mxu0 %v1636_v28 }
 0x245   : > { %1462 = vmatpush3.bf16.msra.mxu0 %v1461_v18 }
 0x246   : > { %1463 = vmatprep.subr.bf16.mxu0 %v1636_v28 }
 0x249   : > { %1465 = vmatpush3.bf16.msra.mxu0 %v1464_v21 }
 0x24a   : > { %1466 = vmatprep.subr.bf16.mxu0 %v1636_v28 }
 0x24d   : > { %1468 = vmatpush3.bf16.msra.mxu0 %v1467_v24 }
 0x24e   : > { %1469 = vmatprep.subr.bf16.mxu0 %v1636_v28 }
 0x251   : > { %1471 = vmatpush3.bf16.msra.mxu0 %v1470_v27 }
 0x252   : > { %1472 = vmatprep.subr.bf16.mxu0 %v1636_v28 }
 0x255   : > { %1474 = vmatpush3.bf16.msra.mxu0 %v1473_v31 }
 0x256   : > { %1475 = vmatprep.subr.bf16.mxu0 %v1636_v28  ;;  %v874_v28 = vsub.s32 3, %v1755_v46 }
 0x258   : > { %v875_v56 = vrot.slane %v1761_v48, %v874_v28 }
 0x259   : > { %1477 = vmatpush3.bf16.msra.mxu0 %v1476_v37 }
 0x30f   : > { %v1231_v49 = vpop.f32.mrb[2].mxu0 }
 0x310   : > { %v693_v50 = vadd.f32 %v1231_v49, %v691_v47  ;;  %v679_v51 = vpop.f32.mrb[3].mxu0 }
 0x311   : > { %v692_v52 = vadd.f32 %v691_v47, %v679_v51 }
 0x312   : > { %695 = vst [vmem:[#allocation2 + $0x8] sm:$0x1] %v693_v50 }
 0x313   : > { %694 = vst [vmem:[#allocation2] sm:$0xff] %v692_v52  ;;  %1300 = vmatmul.mubr.f32.vlgmr.msra.gmra.mrb[4].mxu0 %v692_v52 }
 0x31a   : > { %v714_v53 = vld [vmem:[#allocation2 + $0x1] sm:$0xff] }
 0x31b   : > { %1265 = vmatmul.mubr.f32.vlgmr.msra.gmra.mrb[2].mxu1 %v714_v53 }
 0x3e6   : > { %v868_v54 = vpop.f32.mrb[4].mxu0 }
 0x3e7   : > { %v1301_v55 = vpop.f32.mrb[5].mxu0 }
 0x3ee   : > { %v798_v57 = vpop.f32.mrb[2].mxu1 }
 0x3ef   : > { %v869_v58 = vadd.f32 %v868_v54, %v798_v57  ;;  %v1266_v59 = vpop.f32.mrb[3].mxu1 }
 0x3f1   : > { %v876_v60 = vadd.f32 %v875_v56, %v869_v58 }
 0x3f3   : > { %877 = vst [vmem:[%s206_s12] sm:$0xff] %v876_v60 }
 0x3f4   : > { %1578 = shalt.err (!%p1575_p7)
}
 0x3f5   : > { %s1579_s6 = scalar_lea.hbm %s1791_s22, 128  ;;  %s1583_s27 = scalar_lea.hbm %s1837_s4, 256 }
 0x3f6   : > { %p1580_p8 = scmp.ne.s32.totalorder %s1791_s22, %s1579_s6  ;;  %p1584_p1 = scmp.lt.u32.totalorder %s1791_s22, %s1837_s4 }
 0x3f7   : > { %p1585_p0 = scmp.lt.u32.totalorder %s1583_s27, %s1579_s6  ;;  %p1587_p6 = scmp.lt.u32.totalorder %s1579_s6, %s1791_s22 }
 0x3f8   : > { %p1581_p11 = pnand %p1580_p8, %p1848_p9 }
 0x3f9   : > { %p1586_p5 = por %p1585_p0, %p1584_p1 }
 0x3fa   : > { %p1582_p13 = pneg %p1581_p11 }
 0x3fb   : > { %p1588_p10 = por %p1587_p6, %p1586_p5 }
 0x3fd   : > { %p1589_p12 = pnand %p1588_p10, %p1582_p13 }
 0x3ff   : > { %1592 = shalt.err (!%p1589_p12)
}
 0x400   : > { %1486 = dma.vmem_to_hbm [thread:$0]  (%p1848_p9), %s1793_s13, 128, %s1791_s22, %s879_s23  }
 0x401 PF: > { %p1498_p2 = scmp.ge.s32.totalorder %s1631_s18, 2  ;;  %s904_s10 = sand.u32 1, %s1619_s15  }
 0x402   : > { %p1849_p3 = scmp.ne.s32.totalorder %s1842_s26, 0  ;;  %s905_s11 = scalar_lea.sflag [#allocation6], %s904_s10 }
 0x404   : > { %p1493_p4 = pnand %p1498_p2, %p1849_p3 }
 0x406   : > { %1614 = dma.done.wait (!%p1493_p4), %s905_s11, 128  }
 0x407   : > { %1616 = vsyncadd (!%p1493_p4), %s905_s11, 4294967168  ;;  %p15_p7 = scmp.ge.s32.totalorder %s1690_s21, 4   ;;  %s1850_s15 = smov %s1623_s16 }
 0x408   : > { %s1851_s16 = smov %s1627_s17  ;;  %s1852_s17 = smov %s1701_s24 }
 0x409   : > { %s1853_s18 = smov %s1690_s21  ;;  %17 = sbr.rel (!%p15_p7) target bundleno = 4 (0x4), region = 81 }
 0x410   :  { %910 = vsyncpa [#allocation5], 1 }
 0x411   :  { %912 = vsyncpa [#allocation5 + $0x1], 1 }
 0x412   :  { %913 = vsyncpa [#allocation6], 1 }
 0x413   :  { %915 = vsyncpa [#allocation6 + $0x1], 1 }

</bundles_post_ra>
